<compile_context>
chip_gen: v5e
topology: v5e:2x2
jax: 0.10.0
libtpu: 0.0.40
codegen_flags: <defaults>
</compile_context>

<pallas_src>
import jax
import jax.numpy as jnp
from jax.experimental import pallas as pl
from jax.experimental.pallas import tpu as pltpu


def _mlp_kernel(xt_ref, w1_ref, b1_ref, w2_ref, b2_ref, o_ref):
    # Layer 1 on the MXU: (n_hidden, n_in) @ (n_in, tb) -> (n_hidden, tb),
    # bf16 (or f32) inputs, f32 accumulation.
    h = jnp.dot(w1_ref[...], xt_ref[...], preferred_element_type=jnp.float32)
    h = h + b1_ref[...]            # (n_hidden, 1) broadcast along lanes
    h = jnp.maximum(h, 0.0)        # ReLU

    # Layer 2 (output width 1): VPU multiply + cross-sublane reduce instead of
    # an N=1 MXU matmul.  Result is lane-dense: (1, tb) with batch on lanes.
    o = jnp.sum(h * w2_ref[...], axis=0, keepdims=True) + b2_ref[0]
    o_ref[...] = o.astype(o_ref.dtype)


def mlp_forward(x, w1, b1, w2, b2, *, tb_max=1024, compute_dtype=jnp.bfloat16):
    """Fused MLP forward.

    x:  [B, n_in]
    w1: [n_hidden, n_in]   (PyTorch nn.Linear layout)
    b1: [n_hidden]
    w2: [1, n_hidden]
    b2: [1]
    Returns [B, 1] in x.dtype.
    """
    B, n_in = x.shape
    n_hidden = w1.shape[0]
    out_dtype = x.dtype

    # --- Batch tiling: large, lane-aligned, ragged-safe -----------------------
    # tb is a multiple of 128 (lane width); capped at tb_max so VMEM stays tiny
    # even on v7x (64 MiB).  For large B the grid has many "parallel" steps, so
    # both v7x TensorCores get work.
    b128 = ((B + 127) // 128) * 128
    tb = max(128, (min(tb_max, b128) // 128) * 128)
    b_pad = ((B + tb - 1) // tb) * tb
    grid = (b_pad // tb,)

    # --- Lane-dense / low-precision input layout (wrapper-side plumbing) -----
    xt = x.astype(compute_dtype).T                          # (n_in, B), batch on lanes
    if b_pad != B:
        xt = jnp.pad(xt, ((0, 0), (0, b_pad - B)))          # pad ragged batch

    w1c = w1.astype(compute_dtype)                          # (n_hidden, n_in)
    b1c = b1.astype(jnp.float32).reshape(n_hidden, 1)       # column for lane-broadcast
    w2c = jnp.reshape(w2.astype(jnp.float32), (n_hidden, 1))  # column for lane-broadcast
    b2c = b2.astype(jnp.float32).reshape(1)                 # scalar, lives in SMEM

    # Advisory cost estimate (helps XLA schedule around the custom call).
    bytes_accessed = (
        xt.size * xt.dtype.itemsize
        + w1c.size * w1c.dtype.itemsize
        + (b1c.size + w2c.size + b2c.size) * 4
        + b_pad * jnp.dtype(out_dtype).itemsize
    )
    cost = pl.CostEstimate(
        flops=2 * b_pad * n_in * n_hidden + 2 * b_pad * n_hidden,
        transcendentals=0,
        bytes_accessed=bytes_accessed,
    )

    out_row = pl.pallas_call(
        _mlp_kernel,
        out_shape=jax.ShapeDtypeStruct((1, b_pad), out_dtype),
        grid_spec=pl.GridSpec(
            grid=grid,
            in_specs=[
                # x^T tile: one (n_in, tb) slab per grid step (streamed).
                pl.BlockSpec((n_in, tb), lambda i: (0, i)),
                # Weights / biases: full arrays, constant index map (resident).
                pl.BlockSpec((n_hidden, n_in), lambda i: (0, 0)),
                pl.BlockSpec((n_hidden, 1), lambda i: (0, 0)),
                pl.BlockSpec((n_hidden, 1), lambda i: (0, 0)),
                # b2: single scalar in SMEM (avoids a padded VMEM tile).
                pl.BlockSpec(memory_space=pltpu.MemorySpace.SMEM),
            ],
            # Lane-dense output: (1, tb) row per step, batch on the lane axis.
            out_specs=pl.BlockSpec((1, tb), lambda i: (0, i)),
        ),
        compiler_params=pltpu.CompilerParams(
            dimension_semantics=("parallel",),
        ),
        cost_estimate=cost,
    )(xt, w1c, b1c, w2c, b2c)

    # Layout plumbing back to the PyTorch-style [B, 1] output.
    return out_row[0, :B].reshape(B, 1)


if __name__ == "__main__":
    key = jax.random.PRNGKey(0)
    kx, k1, k2, k3, k4 = jax.random.split(key, 5)

    batch, n_inputs, n_hidden = 16, 16, 32

    x = jax.random.normal(kx, (batch, n_inputs), jnp.float32)
    # PyTorch nn.Linear-style uniform fan-in init, PyTorch layouts.
    bound1 = 1.0 / (n_inputs ** 0.5)
    bound2 = 1.0 / (n_hidden ** 0.5)
    w1 = jax.random.uniform(k1, (n_hidden, n_inputs), jnp.float32, -bound1, bound1)
    b1 = jax.random.uniform(k2, (n_hidden,), jnp.float32, -bound1, bound1)
    w2 = jax.random.uniform(k3, (1, n_hidden), jnp.float32, -bound2, bound2)
    b2 = jax.random.uniform(k4, (1,), jnp.float32, -bound2, bound2)

    # Default (bf16-input) path.
    out = jax.block_until_ready(mlp_forward(x, w1, b1, w2, b2))
    assert out.shape == (batch, 1)

    # Reference with the same bf16 input rounding, f32 accumulation.
    xr = x.astype(jnp.bfloat16).astype(jnp.float32)
    w1r = w1.astype(jnp.bfloat16).astype(jnp.float32)
    h_ref = jnp.maximum(xr @ w1r.T + b1[None, :], 0.0)
    ref = h_ref @ w2.T + b2[None, :]
    assert jnp.allclose(out, ref, atol=1e-3, rtol=1e-3), float(
        jnp.max(jnp.abs(out - ref)))

    # Full-precision path matches the original module's f32 semantics.
    out_f32 = jax.block_until_ready(
        mlp_forward(x, w1, b1, w2, b2, compute_dtype=jnp.float32))
    hi = jax.lax.Precision.HIGHEST
    ref_f32 = (
        jnp.dot(jnp.maximum(jnp.dot(x, w1.T, precision=hi) + b1[None, :], 0.0),
                w2.T, precision=hi)
        + b2[None, :]
    )
    assert jnp.allclose(out_f32, ref_f32, atol=1e-2, rtol=1e-2)

    print("KERNEL_OK")
</pallas_src>

<mosaic_0001>
module attributes {stable_mosaic.version = 11 : i64} {
  func.func @_mlp_kernel(%arg0: i32, %arg1: memref<16x128xbf16, #tpu.memory_space<vmem>>, %arg2: memref<32x16xbf16, #tpu.memory_space<vmem>>, %arg3: memref<32x1xf32, #tpu.memory_space<vmem>>, %arg4: memref<32x1xf32, #tpu.memory_space<vmem>>, %arg5: memref<1xf32, #tpu.memory_space<smem>>, %arg6: memref<1x128xf32, #tpu.memory_space<vmem>>) attributes {dimension_semantics = [#tpu.dimension_semantics<parallel>], iteration_bounds = array<i64: 1>, scalar_prefetch = 0 : i64, scratch_operands = 0 : i64, tpu.core_type = #tpu.core_type<tc>, window_params = [{transform_indices = @transform_0, window_bounds = array<i64: 16, 128>}, {pipeline_mode = #tpu.pipeline_mode<synchronous>, transform_indices = @transform_1, window_bounds = array<i64: 32, 16>}, {pipeline_mode = #tpu.pipeline_mode<synchronous>, transform_indices = @transform_2, window_bounds = array<i64: 32, 1>}, {pipeline_mode = #tpu.pipeline_mode<synchronous>, transform_indices = @transform_3, window_bounds = array<i64: 32, 1>}, {transform_indices = @transform_4, window_bounds = array<i64: 1>}, {transform_indices = @transform_5, window_bounds = array<i64: 1, 128>}]} {
    %c0 = arith.constant 0 : index
    %c0_0 = arith.constant 0 : index
    %0 = vector.load %arg2[%c0, %c0_0] : memref<32x16xbf16, #tpu.memory_space<vmem>>, vector<32x16xbf16>
    %c0_1 = arith.constant 0 : index
    %c0_2 = arith.constant 0 : index
    %1 = vector.load %arg1[%c0_1, %c0_2] : memref<16x128xbf16, #tpu.memory_space<vmem>>, vector<16x128xbf16>
    %cst = arith.constant dense<0.000000e+00> : vector<32x128xf32>
    %2 = tpu.matmul %0, %1, %cst {dimension_numbers = #tpu.dot_dimension_numbers<[1], [0], [0], [1], [0, 0, 1, 1], [], []>} : vector<32x16xbf16>, vector<16x128xbf16>, vector<32x128xf32> -> vector<32x128xf32>
    %c0_3 = arith.constant 0 : index
    %c0_4 = arith.constant 0 : index
    %3 = vector.load %arg3[%c0_3, %c0_4] : memref<32x1xf32, #tpu.memory_space<vmem>>, vector<32x1xf32>
    %4 = vector.broadcast %3 : vector<32x1xf32> to vector<32x128xf32>
    %5 = arith.addf %2, %4 : vector<32x128xf32>
    %cst_5 = arith.constant 0.000000e+00 : f32
    %6 = vector.broadcast %cst_5 : f32 to vector<32x128xf32>
    %7 = arith.maximumf %5, %6 : vector<32x128xf32>
    %c0_6 = arith.constant 0 : index
    %c0_7 = arith.constant 0 : index
    %8 = vector.load %arg4[%c0_6, %c0_7] : memref<32x1xf32, #tpu.memory_space<vmem>>, vector<32x1xf32>
    %9 = vector.broadcast %8 : vector<32x1xf32> to vector<32x128xf32>
    %10 = arith.mulf %7, %9 : vector<32x128xf32>
    %cst_8 = arith.constant dense<0.000000e+00> : vector<128xf32>
    %11 = vector.multi_reduction <add>, %10, %cst_8 [0] : vector<32x128xf32> to vector<128xf32>
    %12 = vector.shape_cast %11 : vector<128xf32> to vector<1x128xf32>
    %c0_9 = arith.constant 0 : index
    %13 = memref.load %arg5[%c0_9] : memref<1xf32, #tpu.memory_space<smem>>
    %14 = vector.broadcast %13 : f32 to vector<1x128xf32>
    %15 = arith.addf %12, %14 : vector<1x128xf32>
    %c0_10 = arith.constant 0 : index
    %c0_11 = arith.constant 0 : index
    %16 = vector.load %arg6[%c0_10, %c0_11] : memref<1x128xf32, #tpu.memory_space<vmem>>, vector<1x128xf32>
    tpu.vector_store %arg6[%c0_10, %c0_11], %15 {strides = array<i32>} : memref<1x128xf32, #tpu.memory_space<vmem>>, vector<1x128xf32>,
    return
  }
  func.func @transform_0(%arg0: i32) -> (i32, i32) {
    %c0_i32 = arith.constant 0 : i32
    %c0_i32_0 = arith.constant 0 : i32
    return %c0_i32, %arg0 : i32, i32
  }
  func.func @transform_1(%arg0: i32) -> (i32, i32) {
    %c0_i32 = arith.constant 0 : i32
    %c0_i32_0 = arith.constant 0 : i32
    %c0_i32_1 = arith.constant 0 : i32
    return %c0_i32, %c0_i32_0 : i32, i32
  }
  func.func @transform_2(%arg0: i32) -> (i32, i32) {
    %c0_i32 = arith.constant 0 : i32
    %c0_i32_0 = arith.constant 0 : i32
    %c0_i32_1 = arith.constant 0 : i32
    return %c0_i32, %c0_i32_0 : i32, i32
  }
  func.func @transform_3(%arg0: i32) -> (i32, i32) {
    %c0_i32 = arith.constant 0 : i32
    %c0_i32_0 = arith.constant 0 : i32
    %c0_i32_1 = arith.constant 0 : i32
    return %c0_i32, %c0_i32_0 : i32, i32
  }
  func.func @transform_4(%arg0: i32) -> i32 {
    %c0_i32 = arith.constant 0 : i32
    %c0_i32_0 = arith.constant 0 : i32
    return %c0_i32 : i32
  }
  func.func @transform_5(%arg0: i32) -> (i32, i32) {
    %c0_i32 = arith.constant 0 : i32
    %c0_i32_0 = arith.constant 0 : i32
    return %c0_i32, %arg0 : i32, i32
  }
}

</mosaic_0001>

<bundles_post_ra>
// kernel: tpu_custom_call.1
= control target key start
LH: loop header
LB: loop body
LE: loop exit
PB: predicated region body
PF: predicated region fallthrough
CT: control target
= control target key end

     0   :  { %v205_v3 = vmov 0   ;;  %vm69_vm0 = vcmask 130048   ;;  %s276_s0 = inlined_call_operand.vmem [shape: bf16[16,128], index: 0, kind: input, shape index: {}]   ;;  %s277_s1 = inlined_call_operand.vmem [shape: bf16[32,16], index: 1, kind: input, shape index: {}]   ;;  %s278_s2 = inlined_call_operand.vmem [shape: f32[32,1], index: 2, kind: input, shape index: {}]   ;;  %s279_s3 = inlined_call_operand.vmem [shape: f32[32,1], index: 3, kind: input, shape index: {}]   ;;  %s280_s4 = inlined_call_operand.<no memory space> [shape: f32[1], index: 4, kind: input, shape index: {}]   ;;  %s281_s5 = inlined_call_operand.hbm [shape: f32[1,128], index: 5, kind: output, shape index: {}]  }
   0x1   :  { %v31_v0 = vld [vmem:[%s278_s2 + $0x10] sm:$0xff]  ;;  %v29_v1 = vld [vmem:[%s278_s2] sm:$0xff]  ;;  %177 = vset.pattern.permute.xlu1 %v205_v3  ;;  %176 = vset.pattern.permute.xlu0 %v205_v3  ;;  %v171_v5 = vld [vmem:[%s277_s1 + $0x8] sm:$0xff] }
   0x2   :  { %v172_v2 = vld [vmem:[%s276_s0] sm:$0xff]  ;;  %45 = vperm.xlu1 %177, %v31_v0   ;;  %35 = vperm.xlu0 %176, %v29_v1  }
   0x3   :  { %v170_v4 = vld [vmem:[%s277_s1] sm:$0xff]  ;;  %83 = vmatpush.bf16.msra.mxu0 %v172_v2  ;;  %173 = vmatpush.bf16.msra.mxu1 %v172_v2 }
   0x4   :  { %v99_v6 = vld [vmem:[%s279_s3] sm:$0xff] }
   0x5   :  { %11 = vsyncpa [#allocation4], 0  ;;  %178 = vset.pattern.permute.xlu2 %v205_v3  ;;  %v32_v7 = vld [vmem:[%s278_s2 + $0x18] sm:$0xff]  ;;  %v30_v8 = vld [vmem:[%s278_s2 + $0x8] sm:$0xff]  ;;  %v137_v44 = vstv %s280_s4  ;;  %s206_s13 = smov [#allocation3]   ;;  %s147_s17 = sshll.u32 %s281_s5, 4  ;;  %s148_s17 = int_to_ptr.hbm [resolvable:$true] %s147_s17 }
   0x6   :  { %105 = vperm.xlu2 %178, %v99_v6   ;;  %168 = vmatmul.msk.bf16.vlgmr.msra.gmra.mxu0 %vm69_vm0, %v170_v4  ;;  %v100_v9 = vld [vmem:[%s279_s3 + $0x8] sm:$0xff]  ;;  %v102_v10 = vld [vmem:[%s279_s3 + $0x18] sm:$0xff]  ;;  %v101_v11 = vld [vmem:[%s279_s3 + $0x10] sm:$0xff]  ;;  %s145_s14 = sshll.u32 %s206_s13, 4  ;;  %s146_s14 = int_to_ptr.vmem [resolvable:$true] %s145_s14 }
   0x7   :  { %169 = vmatmul.msk.bf16.vlgmr.msra.gmra.mxu1 %vm69_vm0, %v171_v5 }
   0xa   :  { %50 = vperm.xlu1 %177, %v32_v7   ;;  %40 = vperm.xlu0 %176, %v30_v8  }
   0xe   :  { %110 = vperm.xlu2 %178, %v100_v9  }
  0x12   :  { %120 = vperm.xlu1 %177, %v102_v10   ;;  %115 = vperm.xlu0 %176, %v101_v11  }
  0x60   :  { %v106_v16 = vpop.permute.xlu2 %105 }
  0x68   :  { %v111_v28 = vpop.permute.xlu2 %110 }
  0x74   :  { %v36_v12 = vpop.permute.xlu0 %35  ;;  %v46_v13 = vpop.permute.xlu1 %45 }
  0x7c   :  { %v41_v17 = vpop.permute.xlu0 %40  ;;  %v51_v19 = vpop.permute.xlu1 %50 }
  0x83   :  { %v85_v14 = vpop.f32.mrf.mxu0 }
  0x84   :  { %v90_v15 = vpop.f32.mrf.mxu1  ;;  %v86_v18 = vadd.f32 %v85_v14, %v36_v12  ;;  %v116_v32 = vpop.permute.xlu0 %115 }
  0x85   :  { %v91_v20 = vadd.f32 %v90_v15, %v46_v13  ;;  %v121_v35 = vpop.permute.xlu1 %120 }
  0x86   :  { %v95_v23 = vmax.f32 %v86_v18, 0.0 }
  0x87   :  { %v97_v26 = vmax.f32 %v91_v20, 0.0 }
  0x88   :  { %v123_v29 = vmul.f32 %v106_v16, %v95_v23 }
  0x89   :  { %v125_v33 = vmul.f32 %v116_v32, %v97_v26 }
  0x8b   :  { %v87_v21 = vpop.f32.mrf.mxu0 }
  0x8c   :  { %v92_v22 = vpop.f32.mrf.mxu1  ;;  %v88_v24 = vadd.f32 %v87_v21, %v41_v17 }
  0x8d   :  { %v93_v25 = vadd.f32 %v92_v22, %v51_v19 }
  0x8e   :  { %v96_v27 = vmax.f32 %v88_v24, 0.0 }
  0x8f   :  { %v98_v31 = vmax.f32 %v93_v25, 0.0 }
  0x90   :  { %v124_v30 = vmul.f32 %v111_v28, %v96_v27 }
  0x91   :  { %v126_v36 = vmul.f32 %v121_v35, %v98_v31 }
  0x92   :  { %v127_v34 = vadd.f32 %v124_v30, %v123_v29 }
  0x94   :  { %v128_v37 = vadd.f32 %v127_v34, %v125_v33 }
  0x96   :  { %v129_v38 = vadd.f32 %v128_v37, %v126_v36 }
  0x98   :  { %v130_v39 = vrot.slane %v129_v38, 4 }
  0x9a   :  { %v131_v40 = vadd.f32 %v130_v39, %v129_v38 }
  0x9c   :  { %v132_v41 = vrot.slane %v131_v40, 2 }
  0x9e   :  { %v133_v42 = vadd.f32 %v132_v41, %v131_v40 }
  0xa0   :  { %v134_v43 = vrot.slane %v133_v42, 1 }
  0xa2   :  { %v135_v45 = vadd.f32 %v134_v43, %v133_v42 }
  0xa4   :  { %v138_v46 = vadd.f32 %v137_v44, %v135_v45 }
  0xa6   :  { %139 = vst [vmem:[#allocation3] sm:$0x1] %v138_v46 }
  0xa7   :  { %150 = dma.vmem_to_hbm [thread:$0]  %s146_s14, 16, %s148_s17, [#allocation4]  }
  0xa8   :  { %203 = dma.done.wait [#allocation4], 16  }
  0xa9   :  { %204 = vsyncadd [#allocation4], 4294967280 }
  0xaa   :  { %155 = vsyncpa [#allocation4], 1 }

</bundles_post_ra>
